<compile_context>
chip_gen: v7x
topology: tpu7x:2x2x1
jax: 0.10.0
libtpu: 0.0.40
codegen_flags: <defaults>
</compile_context>

<pallas_src>
import functools

import jax
import jax.numpy as jnp
from jax import lax
from jax.experimental import pallas as pl
from jax.experimental.pallas import tpu as pltpu


# --------------------------------------------------------------------------
# Kernel 1: 1x1-conv projection prologue (single stacked MXU matmul per tile).
# --------------------------------------------------------------------------
def _proj_kernel(x_ref, w_ref, b_ref, fb_ref, fc_ref, fd_ref, *, C, mxu_dtype):
    # x_ref: (1, C, tn); w_ref: (3C, C) in mxu_dtype; b_ref: (3C, 1) f32.
    x = x_ref[0].astype(mxu_dtype)                                    # (C, tn)
    y = jnp.dot(w_ref[...], x,
                preferred_element_type=jnp.float32) + b_ref[...]     # (3C, tn) f32
    y = y.astype(fb_ref.dtype)
    fb_ref[0] = y[0:C]
    fc_ref[0] = y[C:2 * C]
    fd_ref[0] = y[2 * C:3 * C]


# --------------------------------------------------------------------------
# Kernel 2: flash-attention-style position attention (online softmax).
# --------------------------------------------------------------------------
def _pam_attn_kernel(fb_ref, fc_ref, fd_ref, x_ref, alpha_ref, o_ref,
                     m_s, l_s, acc_s, *, n_valid, tile, needs_mask):
    # fb_ref: (1, C, tq) query projection (resident across key steps)
    # fc_ref/fd_ref: (1, C, tk) key projections (streamed each key step)
    # x_ref: (1, C, tq) residual; alpha_ref: SMEM (1,)
    ki = pl.program_id(2)

    @pl.when(ki == 0)
    def _init():
        m_s[...] = jnp.full(m_s.shape, -jnp.inf, dtype=m_s.dtype)
        l_s[...] = jnp.zeros_like(l_s)
        acc_s[...] = jnp.zeros_like(acc_s)

    fb_q = fb_ref[0]                                                  # (C, tq)
    fc_k = fc_ref[0]                                                  # (C, tk)
    fd_k = fd_ref[0]                                                  # (C, tk)

    # s_t[k, q] = sum_c FC[c, k] * FB[c, q]  == attention logits S[q, k].
    # Contract the C axis of both lane-dense operands directly.
    # TODO(synk): verify via pl.lower_as_mlir that this dim0/dim0 contraction
    # does not insert a per-key-step vxpose; if it does, transpose fb once per
    # query tile at ki == 0 instead (amortized over all key steps).
    s_t = lax.dot_general(fc_k, fb_q,
                          dimension_numbers=(((0,), (0,)), ((), ())),
                          preferred_element_type=jnp.float32)         # (tk, tq)

    if needs_mask:
        # Padded key positions (global index >= n_valid) must not contribute.
        key_idx = ki * tile + lax.broadcasted_iota(jnp.int32, s_t.shape, 0)
        s_t = jnp.where(key_idx < n_valid, s_t, -jnp.inf)

    m_prev = m_s[...]                                                 # (1, tq)
    m_new = jnp.maximum(m_prev, jnp.max(s_t, axis=0, keepdims=True))
    a = jnp.exp(m_prev - m_new)                                       # (1, tq)
    p = jnp.exp(s_t - m_new)                                          # (tk, tq) f32

    l_s[...] = a * l_s[...] + jnp.sum(p, axis=0, keepdims=True)
    # feat_e partial: FD_k @ p -> (C, tq); operands in mxu dtype, f32 accumulate.
    acc_s[...] = a * acc_s[...] + jnp.dot(fd_k, p.astype(fd_k.dtype),
                                          preferred_element_type=jnp.float32)
    m_s[...] = m_new

    @pl.when(ki == pl.num_programs(2) - 1)
    def _finalize():
        inv_l = pl.reciprocal(l_s[...], approx=False)   # exact; once per q-tile
        out = alpha_ref[0] * (acc_s[...] * inv_l) + x_ref[0].astype(jnp.float32)
        o_ref[0] = out.astype(o_ref.dtype)              # lane-dense store


# --------------------------------------------------------------------------
# Generation-aware tiling / VMEM budgeting.
# --------------------------------------------------------------------------
def _tpu_vmem_bytes():
    try:
        info = pltpu.get_tpu_info()
        v = int(getattr(info, "vmem_capacity_bytes", 0) or 0)
        if v > 0:
            return v
    except Exception:
        pass
    return 64 * 1024 * 1024  # conservative fallback: v7x per-TensorCore VMEM


def _attn_vmem_est(C, t, mxu_isz, x_isz):
    return (3 * 2 * C * t * mxu_isz      # FB / FC / FD blocks, double-buffered
            + 2 * C * t * x_isz          # residual x block
            + 2 * C * t * x_isz          # output block
            + C * t * 4 + 2 * t * 4      # acc / m / l scratch (f32)
            + 2 * t * t * 4              # s_t and p temporaries (f32)
            + 2 * C * t * 4)             # relayout / spill headroom


def _proj_vmem_est(C, t, mxu_isz, x_isz):
    return (2 * C * t * x_isz                         # x block, double-buffered
            + 2 * (3 * C * C * mxu_isz + 3 * C * 4)   # stacked weights + biases
            + 3 * 2 * C * t * mxu_isz                 # FB/FC/FD output blocks
            + 3 * C * t * 4 + 2 * C * t * 4)          # f32 matmul result + temps


def _vmem_limit_bytes(est, phys_vmem):
    # Leave ~28% of physical VMEM for Mosaic internal scratch / compiler temps
    # (keeps v7x at ~46 MiB of its 64 MiB, v5e/v6e at ~92 MiB of 128 MiB).
    cap = max(int(phys_vmem * 0.72), 32 * 1024 * 1024)
    return int(min(max(2 * est, 32 * 1024 * 1024), cap))


def _choose_tile(N, C, phys_vmem, mxu_isz, x_isz):
    cap = int(phys_vmem * 0.72 * 0.85)
    big_vmem = phys_vmem >= 96 * 1024 * 1024          # v5e / v6e (128 MiB)
    cands = (1024, 512, 256, 128) if big_vmem else (512, 256, 128)
    t_max = max(128, -(-N // 128) * 128)              # never pad past next 128-mult
    cands = tuple(t for t in cands if t <= t_max) or (128,)
    # Prefer the largest tile that fits in VMEM and divides N (no padding).
    for t in cands:
        if N % t == 0 and _attn_vmem_est(C, t, mxu_isz, x_isz) <= cap:
            return t
    # Otherwise the largest tile that fits; N is padded up and padded keys masked.
    for t in cands:
        if _attn_vmem_est(C, t, mxu_isz, x_isz) <= cap:
            return t
    return 128


# --------------------------------------------------------------------------
# Wrapper.
# --------------------------------------------------------------------------
def position_attention(x_nchw, wb, bb, wc, bc, wd, bd, alpha, *,
                       tile=None, mxu_dtype=None):
    """x_nchw: (B, C, H, W); w*: (C_out, C_in); b*: (C,); alpha: scalar / (1,)."""
    B, C, H, W = x_nchw.shape
    N = H * W
    x_dtype = x_nchw.dtype

    if mxu_dtype is None:
        # Feed the MXU in the model's native precision (no forced f32 upcast of x).
        mxu_dtype = (jnp.bfloat16
                     if jnp.dtype(x_dtype) == jnp.dtype(jnp.bfloat16)
                     else jnp.float32)
    mxu_dtype = jnp.dtype(mxu_dtype)
    mxu_isz = mxu_dtype.itemsize
    x_isz = jnp.dtype(x_dtype).itemsize

    phys_vmem = _tpu_vmem_bytes()
    if tile is None:
        tile = _choose_tile(N, C, phys_vmem, mxu_isz, x_isz)
    assert tile % 128 == 0, "tile must be a multiple of 128 (lane width)"
    t = int(tile)
    n_pad = -(-N // t) * t
    needs_mask = n_pad != N

    x = x_nchw.reshape(B, C, N)                       # free reshape, no transpose
    if needs_mask:
        x = jnp.pad(x, ((0, 0), (0, 0), (0, n_pad - N)))

    w_all = jnp.concatenate([wb, wc, wd], axis=0).astype(mxu_dtype)      # (3C, C)
    b_all = (jnp.concatenate([bb, bc, bd], axis=0)
             .reshape(3 * C, 1).astype(jnp.float32))                     # (3C, 1)
    alpha_ = jnp.asarray(alpha, dtype=jnp.float32).reshape(1)

    # ---- prologue: projections FB / FC / FD, one MXU pass over x ----------
    proj_shape = jax.ShapeDtypeStruct((B, C, n_pad), mxu_dtype)
    proj_spec = pl.BlockSpec((1, C, t), lambda b, n: (b, 0, n))
    fb, fc, fd = pl.pallas_call(
        functools.partial(_proj_kernel, C=C, mxu_dtype=mxu_dtype),
        out_shape=(proj_shape, proj_shape, proj_shape),
        grid_spec=pltpu.PrefetchScalarGridSpec(
            num_scalar_prefetch=0,
            grid=(B, n_pad // t),
            in_specs=[
                pl.BlockSpec((1, C, t), lambda b, n: (b, 0, n)),     # x tile
                pl.BlockSpec((3 * C, C), lambda b, n: (0, 0)),       # stacked W
                pl.BlockSpec((3 * C, 1), lambda b, n: (0, 0)),       # stacked b
            ],
            out_specs=(proj_spec, proj_spec, proj_spec),
        ),
        compiler_params=pltpu.CompilerParams(
            dimension_semantics=("parallel", "parallel"),
            vmem_limit_bytes=_vmem_limit_bytes(
                _proj_vmem_est(C, t, mxu_isz, x_isz), phys_vmem),
        ),
    )(x, w_all, b_all)

    # ---- flash-attention-style PAM (online softmax over key tiles) --------
    out = pl.pallas_call(
        functools.partial(_pam_attn_kernel, n_valid=N, tile=t,
                          needs_mask=needs_mask),
        out_shape=jax.ShapeDtypeStruct((B, C, n_pad), x_dtype),
        grid_spec=pltpu.PrefetchScalarGridSpec(
            num_scalar_prefetch=0,
            grid=(B, n_pad // t, n_pad // t),
            in_specs=[
                pl.BlockSpec((1, C, t), lambda b, qi, ki: (b, 0, qi)),  # FB (query)
                pl.BlockSpec((1, C, t), lambda b, qi, ki: (b, 0, ki)),  # FC (key)
                pl.BlockSpec((1, C, t), lambda b, qi, ki: (b, 0, ki)),  # FD (key)
                pl.BlockSpec((1, C, t), lambda b, qi, ki: (b, 0, qi)),  # x residual
                pl.BlockSpec(memory_space=pltpu.MemorySpace.SMEM),      # alpha
            ],
            out_specs=pl.BlockSpec((1, C, t), lambda b, qi, ki: (b, 0, qi)),
            scratch_shapes=[
                pltpu.VMEM((1, t), jnp.float32),    # m   (running max)
                pltpu.VMEM((1, t), jnp.float32),    # l   (running denominator)
                pltpu.VMEM((C, t), jnp.float32),    # acc (running feat_e)
            ],
        ),
        compiler_params=pltpu.CompilerParams(
            dimension_semantics=("parallel", "parallel", "arbitrary"),
            vmem_limit_bytes=_vmem_limit_bytes(
                _attn_vmem_est(C, t, mxu_isz, x_isz), phys_vmem),
        ),
    )(fb, fc, fd, x, alpha_)

    if needs_mask:
        out = out[:, :, :N]
    return out.reshape(B, C, H, W)


# --------------------------------------------------------------------------
# Plain-JAX reference mirroring the PyTorch forward.
# --------------------------------------------------------------------------
def position_attention_ref(x, wb, bb, wc, bc, wd, bd, alpha):
    B, C, H, W = x.shape
    N = H * W
    prec = lax.Precision.HIGHEST
    xf = x.reshape(B, C, N)
    fb = (jnp.einsum('oc,bcn->bon', wb, xf, precision=prec)
          + bb[None, :, None]).transpose(0, 2, 1)
    fc = jnp.einsum('oc,bcn->bon', wc, xf, precision=prec) + bc[None, :, None]
    att = jax.nn.softmax(jnp.einsum('bnc,bcm->bnm', fb, fc, precision=prec),
                         axis=-1)
    fd = jnp.einsum('oc,bcn->bon', wd, xf, precision=prec) + bd[None, :, None]
    fe = jnp.einsum('bcn,bmn->bcm', fd, att, precision=prec)   # feat_d @ att^T
    return alpha.reshape(()) * fe.reshape(B, C, H, W) + x


if __name__ == "__main__":
    B, C, H, W = 2, 4, 16, 16

    key = jax.random.PRNGKey(0)
    k_x, k_wb, k_bb, k_wc, k_bc, k_wd, k_bd = jax.random.split(key, 7)

    x = jax.random.normal(k_x, (B, C, H, W), dtype=jnp.float32)

    # Conv2d(C, C, 1) weights: (C_out, C_in) (trailing 1x1 dims squeezed).
    wb = 0.1 * jax.random.normal(k_wb, (C, C), dtype=jnp.float32)
    bb = 0.1 * jax.random.normal(k_bb, (C,), dtype=jnp.float32)
    wc = 0.1 * jax.random.normal(k_wc, (C, C), dtype=jnp.float32)
    bc = 0.1 * jax.random.normal(k_bc, (C,), dtype=jnp.float32)
    wd = 0.1 * jax.random.normal(k_wd, (C, C), dtype=jnp.float32)
    bd = 0.1 * jax.random.normal(k_bd, (C,), dtype=jnp.float32)
    # nn.Parameter(torch.zeros(1)) initializes alpha to 0; use a nonzero value
    # so the attention path actually affects the output.
    alpha = jnp.array([0.5], dtype=jnp.float32)

    ref = position_attention_ref(x, wb, bb, wc, bc, wd, bd, alpha)

    # 1) f32 MXU path.  tile=128 -> grid (2, 2, 2): exercises multiple query
    #    tiles AND multiple key steps of the online softmax.
    out = position_attention(x, wb, bb, wc, bc, wd, bd, alpha, tile=128)
    out = jax.block_until_ready(out)
    assert out.shape == (B, C, H, W)
    assert jnp.allclose(out, ref, atol=1e-3, rtol=1e-3), "f32 mismatch vs reference"

    # 2) bf16 MXU operands with f32 accumulation / softmax statistics.
    out_bf = position_attention(x, wb, bb, wc, bc, wd, bd, alpha, tile=128,
                                mxu_dtype=jnp.bfloat16)
    out_bf = jax.block_until_ready(out_bf)
    assert jnp.allclose(out_bf, ref, atol=5e-2, rtol=5e-2), "bf16 mismatch vs reference"

    # 3) Non-128-multiple spatial size (N = 100): exercises the pad + key-mask path.
    B2, C2, H2, W2 = 1, 8, 10, 10
    k2 = jax.random.split(jax.random.PRNGKey(1), 7)
    x2 = jax.random.normal(k2[0], (B2, C2, H2, W2), dtype=jnp.float32)
    wb2 = 0.1 * jax.random.normal(k2[1], (C2, C2), dtype=jnp.float32)
    bb2 = 0.1 * jax.random.normal(k2[2], (C2,), dtype=jnp.float32)
    wc2 = 0.1 * jax.random.normal(k2[3], (C2, C2), dtype=jnp.float32)
    bc2 = 0.1 * jax.random.normal(k2[4], (C2,), dtype=jnp.float32)
    wd2 = 0.1 * jax.random.normal(k2[5], (C2, C2), dtype=jnp.float32)
    bd2 = 0.1 * jax.random.normal(k2[6], (C2,), dtype=jnp.float32)
    out2 = position_attention(x2, wb2, bb2, wc2, bc2, wd2, bd2, alpha)
    out2 = jax.block_until_ready(out2)
    ref2 = position_attention_ref(x2, wb2, bb2, wc2, bc2, wd2, bd2, alpha)
    assert jnp.allclose(out2, ref2, atol=1e-3, rtol=1e-3), "padded-N mismatch vs reference"

    print("KERNEL_OK")
</pallas_src>

<mosaic_0001>
module attributes {stable_mosaic.version = 11 : i64} {
  func.func @_proj_kernel(%arg0: i32, %arg1: i32, %arg2: memref<1x4x128xf32, #tpu.memory_space<vmem>>, %arg3: memref<12x4xf32, #tpu.memory_space<vmem>>, %arg4: memref<12x1xf32, #tpu.memory_space<vmem>>, %arg5: memref<1x4x128xf32, #tpu.memory_space<vmem>>, %arg6: memref<1x4x128xf32, #tpu.memory_space<vmem>>, %arg7: memref<1x4x128xf32, #tpu.memory_space<vmem>>) attributes {dimension_semantics = [#tpu.dimension_semantics<parallel>, #tpu.dimension_semantics<parallel>], iteration_bounds = array<i64: 2, 2>, scalar_prefetch = 0 : i64, scratch_operands = 0 : i64, tpu.core_type = #tpu.core_type<tc>, window_params = [{transform_indices = @transform_0, window_bounds = array<i64: 1, 4, 128>}, {pipeline_mode = #tpu.pipeline_mode<synchronous>, transform_indices = @transform_1, window_bounds = array<i64: 12, 4>}, {pipeline_mode = #tpu.pipeline_mode<synchronous>, transform_indices = @transform_2, window_bounds = array<i64: 12, 1>}, {transform_indices = @transform_3, window_bounds = array<i64: 1, 4, 128>}, {transform_indices = @transform_4, window_bounds = array<i64: 1, 4, 128>}, {transform_indices = @transform_5, window_bounds = array<i64: 1, 4, 128>}]} {
    %c0 = arith.constant 0 : index
    %c0_0 = arith.constant 0 : index
    %c0_1 = arith.constant 0 : index
    %0 = vector.load %arg2[%c0, %c0_0, %c0_1] : memref<1x4x128xf32, #tpu.memory_space<vmem>>, vector<1x4x128xf32>
    %1 = vector.shape_cast %0 : vector<1x4x128xf32> to vector<4x128xf32>
    %c0_2 = arith.constant 0 : index
    %c0_3 = arith.constant 0 : index
    %2 = vector.load %arg3[%c0_2, %c0_3] : memref<12x4xf32, #tpu.memory_space<vmem>>, vector<12x4xf32>
    %cst = arith.constant dense<0.000000e+00> : vector<12x128xf32>
    %3 = tpu.matmul %2, %1, %cst {dimension_numbers = #tpu.dot_dimension_numbers<[1], [0], [0], [1], [0, 0, 1, 1], [], []>} : vector<12x4xf32>, vector<4x128xf32>, vector<12x128xf32> -> vector<12x128xf32>
    %c0_4 = arith.constant 0 : index
    %c0_5 = arith.constant 0 : index
    %4 = vector.load %arg4[%c0_4, %c0_5] : memref<12x1xf32, #tpu.memory_space<vmem>>, vector<12x1xf32>
    %5 = vector.broadcast %4 : vector<12x1xf32> to vector<12x128xf32>
    %6 = arith.addf %3, %5 : vector<12x128xf32>
    %7 = vector.extract_strided_slice %6 {offsets = [0, 0], sizes = [4, 128], strides = [1, 1]} : vector<12x128xf32> to vector<4x128xf32>
    %c0_6 = arith.constant 0 : index
    %c0_7 = arith.constant 0 : index
    %c0_8 = arith.constant 0 : index
    %8 = vector.load %arg5[%c0_6, %c0_7, %c0_8] : memref<1x4x128xf32, #tpu.memory_space<vmem>>, vector<1x4x128xf32>
    %9 = vector.shape_cast %8 : vector<1x4x128xf32> to vector<4x128xf32>
    %10 = vector.shape_cast %7 : vector<4x128xf32> to vector<1x4x128xf32>
    tpu.vector_store %arg5[%c0_6, %c0_7, %c0_8], %10 {strides = array<i32>} : memref<1x4x128xf32, #tpu.memory_space<vmem>>, vector<1x4x128xf32>,
    %11 = vector.extract_strided_slice %6 {offsets = [4, 0], sizes = [4, 128], strides = [1, 1]} : vector<12x128xf32> to vector<4x128xf32>
    %c0_9 = arith.constant 0 : index
    %c0_10 = arith.constant 0 : index
    %c0_11 = arith.constant 0 : index
    %12 = vector.load %arg6[%c0_9, %c0_10, %c0_11] : memref<1x4x128xf32, #tpu.memory_space<vmem>>, vector<1x4x128xf32>
    %13 = vector.shape_cast %12 : vector<1x4x128xf32> to vector<4x128xf32>
    %14 = vector.shape_cast %11 : vector<4x128xf32> to vector<1x4x128xf32>
    tpu.vector_store %arg6[%c0_9, %c0_10, %c0_11], %14 {strides = array<i32>} : memref<1x4x128xf32, #tpu.memory_space<vmem>>, vector<1x4x128xf32>,
    %15 = vector.extract_strided_slice %6 {offsets = [8, 0], sizes = [4, 128], strides = [1, 1]} : vector<12x128xf32> to vector<4x128xf32>
    %c0_12 = arith.constant 0 : index
    %c0_13 = arith.constant 0 : index
    %c0_14 = arith.constant 0 : index
    %16 = vector.load %arg7[%c0_12, %c0_13, %c0_14] : memref<1x4x128xf32, #tpu.memory_space<vmem>>, vector<1x4x128xf32>
    %17 = vector.shape_cast %16 : vector<1x4x128xf32> to vector<4x128xf32>
    %18 = vector.shape_cast %15 : vector<4x128xf32> to vector<1x4x128xf32>
    tpu.vector_store %arg7[%c0_12, %c0_13, %c0_14], %18 {strides = array<i32>} : memref<1x4x128xf32, #tpu.memory_space<vmem>>, vector<1x4x128xf32>,
    return
  }
  func.func @transform_0(%arg0: i32, %arg1: i32) -> (i32, i32, i32) {
    %c0_i32 = arith.constant 0 : i32
    %c0_i32_0 = arith.constant 0 : i32
    return %arg0, %c0_i32, %arg1 : i32, i32, i32
  }
  func.func @transform_1(%arg0: i32, %arg1: i32) -> (i32, i32) {
    %c0_i32 = arith.constant 0 : i32
    %c0_i32_0 = arith.constant 0 : i32
    %c0_i32_1 = arith.constant 0 : i32
    return %c0_i32, %c0_i32_0 : i32, i32
  }
  func.func @transform_2(%arg0: i32, %arg1: i32) -> (i32, i32) {
    %c0_i32 = arith.constant 0 : i32
    %c0_i32_0 = arith.constant 0 : i32
    %c0_i32_1 = arith.constant 0 : i32
    return %c0_i32, %c0_i32_0 : i32, i32
  }
  func.func @transform_3(%arg0: i32, %arg1: i32) -> (i32, i32, i32) {
    %c0_i32 = arith.constant 0 : i32
    %c0_i32_0 = arith.constant 0 : i32
    return %arg0, %c0_i32, %arg1 : i32, i32, i32
  }
  func.func @transform_4(%arg0: i32, %arg1: i32) -> (i32, i32, i32) {
    %c0_i32 = arith.constant 0 : i32
    %c0_i32_0 = arith.constant 0 : i32
    return %arg0, %c0_i32, %arg1 : i32, i32, i32
  }
  func.func @transform_5(%arg0: i32, %arg1: i32) -> (i32, i32, i32) {
    %c0_i32 = arith.constant 0 : i32
    %c0_i32_0 = arith.constant 0 : i32
    return %arg0, %c0_i32, %arg1 : i32, i32, i32
  }
}

</mosaic_0001>

<bundles_post_ra>
// kernel: tpu_custom_call.1
= control target key start
LH: loop header
LB: loop body
LE: loop exit
PB: predicated region body
PF: predicated region fallthrough
CT: control target
= control target key end

     0   :  { %s1104_s0 = inlined_call_operand.vmem [shape: f32[2,4,256], index: 0, kind: input, shape index: {}]   ;;  %s1105_s1 = inlined_call_operand.vmem [shape: f32[12,4], index: 1, kind: input, shape index: {}]   ;;  %s1106_s2 = inlined_call_operand.vmem [shape: f32[12,1], index: 2, kind: input, shape index: {}]   ;;  %s1107_s3 = inlined_call_operand.hbm [shape: f32[2,4,256], index: 3, kind: output, shape index: {0}]   ;;  %s1108_s4 = inlined_call_operand.hbm [shape: f32[2,4,256], index: 4, kind: output, shape index: {1}]   ;;  %s1109_s5 = inlined_call_operand.hbm [shape: f32[2,4,256], index: 5, kind: output, shape index: {2}]  }
   0x1   :  { %1113 = sst [smem:[#allocation9_spill]] %s1104_s0 }
   0x2   :  { %1114 = sst [smem:[#allocation10_spill]] %s1105_s1 }
   0x3   :  { %1115 = sst [smem:[#allocation11_spill]] %s1106_s2 }
   0x4   :  { %11 = vsyncpa [#allocation3], 0 }
   0x5   :  { %13 = vsyncpa [#allocation3 + $0x1], 0 }
   0x6   :  { %14 = vsyncpa [#allocation5], 0 }
   0x7   :  { %16 = vsyncpa [#allocation5 + $0x1], 0  ;;  %s878_s18 = smov 0   ;;  %s880_s19 = smov 0  }
   0x8   :  { %s882_s20 = smov 0   ;;  %s884_s21 = smov 0  }
   0x9   :  { %s886_s22 = smov 0   ;;  %s888_s23 = smov 0  }
   0xa   :  { %s890_s24 = smov 0   ;;  %s892_s25 = smov 0  }
   0xb LB: > { %s1111_s26 = sadd.s32 4294967295, %s842_s25   ;;  %s1110_s27 = sadd.s32 4294967294, %s842_s25   ;;  %s842_s25 = sphi %s892_s25, %s22_s25   ;;  %s838_s24 = sphi %s890_s24, %s1130_s24   ;;  %s834_s23 = sphi %s888_s23, %s1129_s23   ;;  %s830_s22 = sphi %s886_s22, %s1128_s22   ;;  %s826_s21 = sphi %s884_s21, %s1127_s21   ;;  %s822_s20 = sphi %s882_s20, %s1126_s20   ;;  %s818_s19 = sphi %s880_s19, %s1125_s19   ;;  %s814_s18 = sphi %s878_s18, %s1124_s18  }
   0xc   : > { %s31_s28 = sadd.s32 1, %s834_s23  ;;  %s34_s29 = sadd.s32 1, %s838_s24 }
   0xd   : > { %p32_p0 = scmp.ge.s32.totalorder %s31_s28, 2  ;;  %p123_p1 = scmp.ne.s32.totalorder %s822_s20, %s818_s19 }
   0xe   : > { %p124_p2 = scmp.eq.s32.totalorder %s1111_s26, 3  ;;  %p129_p5 = scmp.ne.s32.totalorder %s818_s19, %s814_s18 }
   0xf   : > { %s1132_s28 = smov (%p32_p0, %s31_s28), 0  ;;  %s1134_s29 = smov (!%p32_p0, %s34_s29), %s838_s24 }
  0x10   : > { %s109_s30 = ssub.s32 %s834_s23, %s1132_s28  ;;  %p931_p3 = por %p124_p2, %p123_p1 }
  0x11   : > { %p36_p4 = scmp.ge.s32.totalorder %s1134_s29, 2  ;;  %p130_p6 = scmp.eq.s32.totalorder %s1110_s27, 3 }
  0x12   : > { %p577_p7 = scmp.ge.s32.totalorder %s842_s25, 1  ;;  %p221_p9 = scmp.lt.s32.totalorder %s842_s25, 5 }
  0x13   : > { %s1136_s29 = smov (%p36_p4, %s1134_s29), 0  ;;  %p942_p8 = por %p130_p6, %p129_p5 }
  0x14   : > { %s108_s8 = ssub.s32 %s838_s24, %s1136_s29  ;;  %s113_s9 = sadd.s32 1, %s822_s20 }
  0x15   : > { %s110_s10 = sor.u32 %s109_s30, %s108_s8  ;;  %p222_p10 = pnand %p577_p7, %p221_p9 }
  0x16   : > { %p111_p11 = scmp.eq.s32.totalorder %s110_s10, 0  ;;  %p262_p12 = scmp.lt.s32.totalorder (!%p222_p10), %s830_s22, 1  ;;  %vm285_vm0 = vcmask (!%p222_p10), 31744   ;;  %v844_v1 = vmov (!%p222_p10), 0   ;;  %vm292_vm1 = vcmask (!%p222_p10), 1043456  }
  0x17   : > { %225 = sbr.rel (%p222_p10) target bundleno = 321 (0x141), region = 32  ;;  %p264_p13 = scmp.lt.s32.totalorder (!%p222_p10), %s826_s21, 1  ;;  %687 = vset.pattern.permute.xlu0 (!%p222_p10), %v844_v1 }
  0x18   : > { %s951_s11 = scalar_select %p111_p11, %s822_s20, %s113_s9  }
  0x19   : > { %s1118_s1 = sld [smem:[#allocation10_spill]] (!%p222_p10)  ;;  %s1119_s2 = sld [smem:[#allocation11_spill]] (!%p222_p10) }
  0x1a   : > { %s1120_s0 = sld [smem:[#allocation9_spill]] (!%p222_p10)  ;;  %s1112_s30 = sand.u32 (!%p222_p10), 1, %s818_s19  }
  0x1e   : > { %s263_s16 = scalar_select %p262_p12, %s830_s22, 1 }
  0x1f   : > { %v271_v0 = vld [vmem:[%s1118_s1] sm:$0xff]  ;;  %s265_s17 = scalar_select %p264_p13, %s826_s21, 1  ;;  %v274_v3 = vld [vmem:[%s1119_s2 + $0x8] sm:$0xf] }
  0x20   : > { %602 = vmatprep.mubr.msk.f32.mxu0 %vm285_vm0, %v271_v0  ;;  %v273_v2 = vld [vmem:[%s1119_s2] sm:$0xff]  ;;  %s581_s9 = sshll.u32 %s263_s16, 1  ;;  %v272_v5 = vld [vmem:[%s1118_s1 + $0x8] sm:$0xf]  ;;  %s589_s16 = sshll.u32 %s830_s22, 1 }
  0x21   : > { %277 = vperm.xlu0 %687, %v273_v2   ;;  %s267_s10 = sadd.s32 %s581_s9, %s265_s17  ;;  %s578_s17 = sshll.u32 %s1112_s30, 2 }
  0x22   : > { %s582_s12 = sshll.u32 %s267_s10, 2  ;;  %s396_s8 = sadd.s32 %s826_s21, %s589_s16 }
  0x23   : > { %s269_s15 = scalar_lea.vmem %s1120_s0, %s582_s12  ;;  %s1121_s9 = sadd.s32 4294967295, %s842_s25  }
  0x24   : > { %v270_v4 = vld [vmem:[%s269_s15] sm:$0xf]  ;;  %s981_s10 = sand.u32 1, %s1121_s9   ;;  %s590_s13 = sshll.u32 %s396_s8, 6 }
  0x25   : > { %282 = vperm.xlu0 %687, %v274_v3   ;;  %600 = vmatprep.subr.msk.mxu0 %vm292_vm1, %v270_v4  ;;  %s254_s12 = scalar_lea.vmem [#allocation4], %s578_s17  ;;  %s261_s26 = scalar_lea.vmem [#allocation6], %s578_s17 }
  0x26   : > { %601 = vmatpush3.msk.msra.mxu0 %vm292_vm1, %v270_v4  ;;  %s415_s14 = sshll.u32 %s254_s12, 4  ;;  %s430_s27 = sshll.u32 %s261_s26, 4  ;;  %s988_s14 = int_to_ptr.vmem [resolvable:$true] %s415_s14  ;;  %s997_s27 = int_to_ptr.vmem [resolvable:$true] %s430_s27 }
  0x27   : > { %603 = vmatmul.mubr.msk.f32.vlgmr.msra.gmra.mrb[0].mxu0 %vm285_vm0, %v272_v5  ;;  %s247_s15 = scalar_lea.vmem [#allocation2], %s578_s17  ;;  %s986_s21 = scalar_lea.hbm %s1108_s4, %s590_s13 }
  0x28   : > { %s400_s0 = sshll.u32 %s247_s15, 4  ;;  %s993_s17 = scalar_lea.hbm %s1107_s3, %s590_s13  ;;  %s995_s0 = int_to_ptr.vmem [resolvable:$true] %s400_s0 }
  0x29   : > { %s1002_s22 = scalar_lea.hbm %s1109_s5, %s590_s13  ;;  %s380_s1 = scalar_lea.sflag [#allocation5], %s981_s10 }
  0x2a   : > { %s688_s2 = scalar_lea.vmem %s988_s14, 64 }
  0x2b   : > { %p689_p0 = scmp.ne.s32.totalorder %s988_s14, %s688_s2 }
  0x2d   : > { %p690_p1 = pnand %p689_p0, %p931_p3 }
  0x2f   : > { %p691_p2 = pneg %p690_p1 }
  0xa0   : > { %v278_v6 = vpop.permute.xlu0 %277 }
  0xa4   : > { %v283_v7 = vpop.permute.xlu0 %282 }
  0xfa   : > { %v604_v8 = vpop.f32.mrb[0].mxu0 }
  0xfb   : > { %v368_v9 = vadd.f32 %v604_v8, %v283_v7  ;;  %v362_v10 = vpop.f32.mrb[1].mxu0 }
  0xfc   : > { %v363_v11 = vadd.f32 %v362_v10, %v278_v6 }
  0xfd   : > { %373 = vst [vmem:[%s261_s26] sm:$0xf] %v368_v9  ;;  %s845_s26 = smov [#allocation4]  }
  0xfe   : > { %371 = vst [vmem:[%s247_s15] sm:$0xf] %v363_v11  ;;  %372 = vst [vmem:[%s254_s12 - $0x4] sm:$0xf0] %v363_v11  ;;  %s692_s16 = sshll.u32 %s845_s26, 4  ;;  %s693_s16 = int_to_ptr.vmem [resolvable:$false] %s692_s16 }
  0xff   : > { %s694_s8 = scalar_lea.vmem %s693_s16, 128  ;;  %p695_p4 = scmp.lt.s32.totalorder %s988_s14, %s693_s16 }
 0x100   : > { %p696_p5 = scmp.lt.s32.totalorder %s694_s8, %s688_s2 }
 0x102   : > { %p697_p6 = por %p696_p5, %p695_p4 }
 0x104   : > { %p698_p7 = pnand %p697_p6, %p691_p2 }
 0x106   : > { %701 = shalt.err (!%p698_p7)
}
 0x107   : > { %s702_s13 = scalar_lea.hbm %s986_s21, 64  ;;  %s706_s30 = scalar_lea.hbm %s1108_s4, 256 }
 0x108   : > { %p703_p9 = scmp.ne.s32.totalorder %s986_s21, %s702_s13  ;;  %p707_p12 = scmp.lt.u32.totalorder %s986_s21, %s1108_s4 }
 0x109   : > { %p708_p13 = scmp.lt.u32.totalorder %s706_s30, %s702_s13  ;;  %p710_p1 = scmp.lt.u32.totalorder %s702_s13, %s986_s21 }
 0x10a   : > { %p704_p10 = pnand %p703_p9, %p931_p3 }
 0x10b   : > { %p709_p0 = por %p708_p13, %p707_p12 }
 0x10c   : > { %p705_p11 = pneg %p704_p10 }
 0x10d   : > { %p711_p2 = por %p710_p1, %p709_p0 }
 0x10f   : > { %p712_p4 = pnand %p711_p2, %p705_p11 }
 0x111   : > { %715 = shalt.err (!%p712_p4)
}
 0x112   : > { %606 = dma.vmem_to_hbm [thread:$0]  (%p931_p3), %s988_s14, 64, %s986_s21, %s380_s1  }
 0x113   : > { %s1122_s2 = sand.u32 1, %s818_s19   ;;  %s716_s8 = scalar_lea.vmem %s995_s0, 64 }
 0x114   : > { %s375_s16 = scalar_lea.sflag [#allocation3], %s1122_s2  ;;  %p717_p5 = scmp.ne.s32.totalorder %s995_s0, %s716_s8 }
 0x115   : > { %s846_s13 = smov [#allocation2]  }
 0x116   : > { %p718_p6 = pnand %p717_p5, %p931_p3  ;;  %s720_s12 = sshll.u32 %s846_s13, 4  ;;  %s721_s12 = int_to_ptr.vmem [resolvable:$false] %s720_s12 }
 0x117   : > { %s722_s15 = scalar_lea.vmem %s721_s12, 128  ;;  %p723_p9 = scmp.lt.s32.totalorder %s995_s0, %s721_s12 }
 0x118   : > { %p719_p7 = pneg %p718_p6  ;;  %p724_p10 = scmp.lt.s32.totalorder %s722_s15, %s716_s8 }
 0x11a   : > { %p725_p11 = por %p724_p10, %p723_p9 }
 0x11c   : > { %p726_p12 = pnand %p725_p11, %p719_p7 }
 0x11e   : > { %729 = shalt.err (!%p726_p12)
}
 0x11f   : > { %s730_s14 = scalar_lea.hbm %s993_s17, 64  ;;  %s734_s9 = scalar_lea.hbm %s1107_s3, 256 }
 0x120   : > { %p731_p13 = scmp.ne.s32.totalorder %s993_s17, %s730_s14  ;;  %p735_p2 = scmp.lt.u32.totalorder %s993_s17, %s1107_s3 }
 0x121   : > { %p736_p4 = scmp.lt.u32.totalorder %s734_s9, %s730_s14  ;;  %p738_p6 = scmp.lt.u32.totalorder %s730_s14, %s993_s17 }
 0x122   : > { %p732_p0 = pnand %p731_p13, %p931_p3 }
 0x123   : > { %p737_p5 = por %p736_p4, %p735_p2 }
 0x124   : > { %p733_p1 = pneg %p732_p0 }
 0x125   : > { %p739_p7 = por %p738_p6, %p737_p5 }
 0x127   : > { %p740_p9 = pnand %p739_p7, %p733_p1 }
 0x129   : > { %743 = shalt.err (!%p740_p9)
}
 0x12a   : > { %605 = dma.vmem_to_hbm [thread:$0]  (%p931_p3), %s995_s0, 64, %s993_s17, %s375_s16  }
 0x12b   : > { %s744_s8 = scalar_lea.vmem %s997_s27, 64  ;;  %s847_s13 = smov [#allocation6]  }
 0x12c   : > { %p745_p10 = scmp.ne.s32.totalorder %s997_s27, %s744_s8  ;;  %s748_s12 = sshll.u32 %s847_s13, 4  ;;  %s749_s12 = int_to_ptr.vmem [resolvable:$false] %s748_s12 }
 0x12d   : > { %s750_s15 = scalar_lea.vmem %s749_s12, 128  ;;  %p751_p13 = scmp.lt.s32.totalorder %s997_s27, %s749_s12 }
 0x12e   : > { %p746_p11 = pnand %p745_p10, %p931_p3  ;;  %p752_p0 = scmp.lt.s32.totalorder %s750_s15, %s744_s8 }
 0x130   : > { %p747_p12 = pneg %p746_p11  ;;  %p753_p1 = por %p752_p0, %p751_p13 }
 0x132   : > { %p754_p2 = pnand %p753_p1, %p747_p12 }
 0x134   : > { %757 = shalt.err (!%p754_p2)
}
 0x135   : > { %s758_s0 = scalar_lea.hbm %s1002_s22, 64  ;;  %s762_s14 = scalar_lea.hbm %s1109_s5, 256 }
 0x136   : > { %p759_p4 = scmp.ne.s32.totalorder %s1002_s22, %s758_s0  ;;  %p763_p7 = scmp.lt.u32.totalorder %s1002_s22, %s1109_s5 }
 0x137   : > { %p764_p9 = scmp.lt.u32.totalorder %s762_s14, %s758_s0  ;;  %p766_p11 = scmp.lt.u32.totalorder %s758_s0, %s1002_s22 }
 0x138   : > { %p760_p5 = pnand %p759_p4, %p931_p3 }
 0x139   : > { %p765_p10 = por %p764_p9, %p763_p7 }
 0x13a   : > { %p761_p6 = pneg %p760_p5 }
 0x13b   : > { %p767_p12 = por %p766_p11, %p765_p10 }
 0x13d   : > { %p768_p13 = pnand %p767_p12, %p761_p6 }
 0x13f   : > { %771 = shalt.err (!%p768_p13)
}
 0x140   : > { %607 = dma.vmem_to_hbm [thread:$0]  (%p931_p3), %s997_s27, 64, %s1002_s22, %s380_s1  }
 0x141 PF: > { %p621_p0 = scmp.ge.s32.totalorder %s842_s25, 2  ;;  %s442_s9 = sand.u32 1, %s814_s18  }
 0x142   : > { %s443_s26 = scalar_lea.sflag [#allocation3], %s442_s9 }
 0x143   : > { %p612_p1 = pnand %p621_p0, %p942_p8 }
 0x145   : > { %805 = dma.done.wait (!%p612_p1), %s443_s26, 64  }
 0x146   : > { %807 = vsyncadd (!%p612_p1), %s443_s26, 4294967232  ;;  %s1123_s2 = sadd.s32 4294967294, %s842_s25  }
 0x147   : > { %s451_s8 = sand.u32 1, %s1123_s2  }
 0x148   : > { %s452_s6 = scalar_lea.sflag [#allocation5], %s451_s8 }
 0x149   : > { %809 = dma.done.wait (!%p612_p1), %s452_s6, 128  }
 0x14a   : > { %811 = vsyncadd (!%p612_p1), %s452_s6, 4294967168  ;;  %s22_s25 = sadd.s32 1, %s842_s25   ;;  %s1124_s18 = smov %s818_s19 }
 0x14b   : > { %p19_p3 = scmp.ge.s32.totalorder %s22_s25, 6   ;;  %s1125_s19 = smov %s822_s20 }
 0x14c   : > { %s1126_s20 = smov %s951_s11  ;;  %s1127_s21 = smov %s834_s23 }
 0x14d   : > { %s1128_s22 = smov %s838_s24  ;;  %s1129_s23 = smov %s1132_s28 }
 0x14e   : > { %s1130_s24 = smov %s1136_s29  ;;  %21 = sbr.rel (!%p19_p3) target bundleno = 11 (0xb), region = 99 }
 0x155   :  { %466 = vsyncpa [#allocation3], 1 }
 0x156   :  { %468 = vsyncpa [#allocation3 + $0x1], 1 }
 0x157   :  { %469 = vsyncpa [#allocation5], 1 }
 0x158   :  { %471 = vsyncpa [#allocation5 + $0x1], 1 }

</bundles_post_ra>
